<compile_context>
chip_gen: v7x
topology: tpu7x:2x2x1
jax: 0.10.0
libtpu: 0.0.40
codegen_flags: <defaults>
</compile_context>

<pallas_src>
import jax
import jax.numpy as jnp
from jax.experimental import pallas as pl
from jax.experimental.pallas import tpu as pltpu

_LANE = 128
_MAX_OUTSTANDING_DMAS = 8          # 4-8 outstanding descriptors keeps the DMA engine busy
_MIN_KERNEL_BYTES = 64 * 1024      # below this a kernel launch costs more than the copy


def _chunk_rows(rows):
    """Split `rows` into up to _MAX_OUTSTANDING_DMAS contiguous, static ranges."""
    nchunks = min(_MAX_OUTSTANDING_DMAS, rows)
    base, rem = divmod(rows, nchunks)
    starts, sizes = [], []
    off = 0
    for i in range(nchunks):
        sz = base + (1 if i < rem else 0)
        starts.append(off)
        sizes.append(sz)
        off += sz
    return starts, sizes


def _make_dma_copy_kernel(starts, sizes):
    """Chunked HBM->HBM copy: issue all DMAs, then wait on all of them."""
    nchunks = len(starts)

    def kernel(x_hbm, o_hbm, sems):
        copies = []
        for i in range(nchunks):
            cp = pltpu.make_async_copy(
                x_hbm.at[pl.ds(starts[i], sizes[i])],
                o_hbm.at[pl.ds(starts[i], sizes[i])],
                sems.at[i],
            )
            cp.start()
            copies.append(cp)
        for cp in copies:
            cp.wait()

    return kernel, nchunks


def _pallas_copy_2d(x2d):
    rows, _ = x2d.shape
    starts, sizes = _chunk_rows(rows)
    kernel, nchunks = _make_dma_copy_kernel(starts, sizes)
    return pl.pallas_call(
        kernel,
        out_shape=jax.ShapeDtypeStruct(x2d.shape, x2d.dtype),
        in_specs=[pl.BlockSpec(memory_space=pl.ANY)],   # raw HBM ref, no auto-DMA
        out_specs=pl.BlockSpec(memory_space=pl.ANY),    # raw HBM ref, written by DMA
        scratch_shapes=[pltpu.SemaphoreType.DMA((nchunks,))],
    )(x2d)


def _pick_2d_shape(n):
    """Factor flat size n into (rows, lanes); prefer lane-dense lanes (multiple
    of 128) with rows >= 8 so the copy splits into several DMA chunks."""
    if n % _LANE == 0:
        for cand in (4096, 2048, 1024, 512, 256, _LANE):
            if n % cand == 0 and (n // cand) >= 8:
                return n // cand, cand
        return n // _LANE, _LANE
    # Not a multiple of 128: DMA has no VMEM-tile constraint, so (1, n) is fine
    # (single contiguous HBM->HBM descriptor, never touches VMEM).
    return 1, n


def identity_pallas(x, *, min_kernel_bytes=_MIN_KERNEL_BYTES):
    """Identity forward pass (myModel.forward(x) == x).

    Large inputs go through a chunked HBM->HBM DMA Pallas copy kernel; tiny or
    degenerate inputs bypass the kernel entirely (identity needs no compute).
    """
    if x.ndim == 0 or x.size == 0:
        return x
    nbytes = x.size * jnp.dtype(x.dtype).itemsize
    if nbytes < min_kernel_bytes:
        return x

    rows, lanes = _pick_2d_shape(x.size)
    x2d = x.reshape(rows, lanes)          # contiguous reshape: metadata only
    out = _pallas_copy_2d(x2d)
    return out.reshape(x.shape)


if __name__ == "__main__":
    key = jax.random.PRNGKey(0)
    k_small, k_big, k_odd = jax.random.split(key, 3)

    # Spec-sized NCHW input (2, 4, 16, 16): tiny -> bypass path.
    x = jax.random.normal(k_small, (2, 4, 16, 16), dtype=jnp.float32)
    y = identity_pallas(x)
    jax.block_until_ready(y)
    assert y.shape == x.shape and y.dtype == x.dtype
    assert bool(jnp.array_equal(y, x))

    # Same spec-shaped input, forced through the Pallas DMA kernel.
    y_forced = identity_pallas(x, min_kernel_bytes=0)
    jax.block_until_ready(y_forced)
    assert y_forced.shape == x.shape and y_forced.dtype == x.dtype
    assert bool(jnp.array_equal(y_forced, x))

    # Larger bf16 input (2 MiB) that takes the kernel path by default.
    x_big = jax.random.normal(k_big, (8, 256, 512), dtype=jnp.float32).astype(jnp.bfloat16)
    y_big = identity_pallas(x_big)
    jax.block_until_ready(y_big)
    assert y_big.shape == x_big.shape and y_big.dtype == x_big.dtype
    assert bool(jnp.array_equal(y_big, x_big))

    # Flat size not a multiple of 128 (exercises the (1, n) DMA fallback).
    x_odd = jax.random.normal(k_odd, (3, 5, 7, 11), dtype=jnp.float32)
    y_odd = identity_pallas(x_odd, min_kernel_bytes=0)
    jax.block_until_ready(y_odd)
    assert y_odd.shape == x_odd.shape and y_odd.dtype == x_odd.dtype
    assert bool(jnp.array_equal(y_odd, x_odd))

    print("KERNEL_OK")
</pallas_src>

<mosaic_0001>
module attributes {stable_mosaic.version = 11 : i64} {
  func.func @kernel(%arg0: memref<8x256xf32, #tpu.memory_space<any>>, %arg1: memref<8x256xf32, #tpu.memory_space<any>>, %arg2: memref<8x!tpu.dma_semaphore, #tpu.memory_space<semaphore_mem>>) attributes {dimension_semantics = [], scalar_prefetch = 0 : i64, scratch_operands = 1 : i64, tpu.core_type = #tpu.core_type<tc>} {
    %c0_i32 = arith.constant 0 : i32
    %c0_i32_0 = arith.constant 0 : i32
    %c0_i32_1 = arith.constant 0 : i32
    %0 = tpu.memref_slice %arg0[%c0_i32_0, %c0_i32_1] : memref<8x256xf32, #tpu.memory_space<any>> -> memref<1x256xf32, #tpu.memory_space<any>>
    %c0_i32_2 = arith.constant 0 : i32
    %c0_i32_3 = arith.constant 0 : i32
    %1 = tpu.memref_slice %arg1[%c0_i32_2, %c0_i32_3] : memref<8x256xf32, #tpu.memory_space<any>> -> memref<1x256xf32, #tpu.memory_space<any>>
    %2 = tpu.memref_slice %arg2[%c0_i32] : memref<8x!tpu.dma_semaphore, #tpu.memory_space<semaphore_mem>> -> memref<1x!tpu.dma_semaphore, #tpu.memory_space<semaphore_mem>>
    %3 = tpu.memref_squeeze %2 : memref<1x!tpu.dma_semaphore, #tpu.memory_space<semaphore_mem>> -> memref<!tpu.dma_semaphore, #tpu.memory_space<semaphore_mem>>
    tpu.enqueue_dma source(%0 : memref<1x256xf32, #tpu.memory_space<any>>) target(%1 : memref<1x256xf32, #tpu.memory_space<any>>) target_semaphore(%3 : memref<!tpu.dma_semaphore, #tpu.memory_space<semaphore_mem>>)
    %c1_i32 = arith.constant 1 : i32
    %c1_i32_4 = arith.constant 1 : i32
    %c0_i32_5 = arith.constant 0 : i32
    %4 = tpu.memref_slice %arg0[%c1_i32_4, %c0_i32_5] : memref<8x256xf32, #tpu.memory_space<any>> -> memref<1x256xf32, #tpu.memory_space<any>>
    %c1_i32_6 = arith.constant 1 : i32
    %c0_i32_7 = arith.constant 0 : i32
    %5 = tpu.memref_slice %arg1[%c1_i32_6, %c0_i32_7] : memref<8x256xf32, #tpu.memory_space<any>> -> memref<1x256xf32, #tpu.memory_space<any>>
    %6 = tpu.memref_slice %arg2[%c1_i32] : memref<8x!tpu.dma_semaphore, #tpu.memory_space<semaphore_mem>> -> memref<1x!tpu.dma_semaphore, #tpu.memory_space<semaphore_mem>>
    %7 = tpu.memref_squeeze %6 : memref<1x!tpu.dma_semaphore, #tpu.memory_space<semaphore_mem>> -> memref<!tpu.dma_semaphore, #tpu.memory_space<semaphore_mem>>
    tpu.enqueue_dma source(%4 : memref<1x256xf32, #tpu.memory_space<any>>) target(%5 : memref<1x256xf32, #tpu.memory_space<any>>) target_semaphore(%7 : memref<!tpu.dma_semaphore, #tpu.memory_space<semaphore_mem>>)
    %c2_i32 = arith.constant 2 : i32
    %c2_i32_8 = arith.constant 2 : i32
    %c0_i32_9 = arith.constant 0 : i32
    %8 = tpu.memref_slice %arg0[%c2_i32_8, %c0_i32_9] : memref<8x256xf32, #tpu.memory_space<any>> -> memref<1x256xf32, #tpu.memory_space<any>>
    %c2_i32_10 = arith.constant 2 : i32
    %c0_i32_11 = arith.constant 0 : i32
    %9 = tpu.memref_slice %arg1[%c2_i32_10, %c0_i32_11] : memref<8x256xf32, #tpu.memory_space<any>> -> memref<1x256xf32, #tpu.memory_space<any>>
    %10 = tpu.memref_slice %arg2[%c2_i32] : memref<8x!tpu.dma_semaphore, #tpu.memory_space<semaphore_mem>> -> memref<1x!tpu.dma_semaphore, #tpu.memory_space<semaphore_mem>>
    %11 = tpu.memref_squeeze %10 : memref<1x!tpu.dma_semaphore, #tpu.memory_space<semaphore_mem>> -> memref<!tpu.dma_semaphore, #tpu.memory_space<semaphore_mem>>
    tpu.enqueue_dma source(%8 : memref<1x256xf32, #tpu.memory_space<any>>) target(%9 : memref<1x256xf32, #tpu.memory_space<any>>) target_semaphore(%11 : memref<!tpu.dma_semaphore, #tpu.memory_space<semaphore_mem>>)
    %c3_i32 = arith.constant 3 : i32
    %c3_i32_12 = arith.constant 3 : i32
    %c0_i32_13 = arith.constant 0 : i32
    %12 = tpu.memref_slice %arg0[%c3_i32_12, %c0_i32_13] : memref<8x256xf32, #tpu.memory_space<any>> -> memref<1x256xf32, #tpu.memory_space<any>>
    %c3_i32_14 = arith.constant 3 : i32
    %c0_i32_15 = arith.constant 0 : i32
    %13 = tpu.memref_slice %arg1[%c3_i32_14, %c0_i32_15] : memref<8x256xf32, #tpu.memory_space<any>> -> memref<1x256xf32, #tpu.memory_space<any>>
    %14 = tpu.memref_slice %arg2[%c3_i32] : memref<8x!tpu.dma_semaphore, #tpu.memory_space<semaphore_mem>> -> memref<1x!tpu.dma_semaphore, #tpu.memory_space<semaphore_mem>>
    %15 = tpu.memref_squeeze %14 : memref<1x!tpu.dma_semaphore, #tpu.memory_space<semaphore_mem>> -> memref<!tpu.dma_semaphore, #tpu.memory_space<semaphore_mem>>
    tpu.enqueue_dma source(%12 : memref<1x256xf32, #tpu.memory_space<any>>) target(%13 : memref<1x256xf32, #tpu.memory_space<any>>) target_semaphore(%15 : memref<!tpu.dma_semaphore, #tpu.memory_space<semaphore_mem>>)
    %c4_i32 = arith.constant 4 : i32
    %c4_i32_16 = arith.constant 4 : i32
    %c0_i32_17 = arith.constant 0 : i32
    %16 = tpu.memref_slice %arg0[%c4_i32_16, %c0_i32_17] : memref<8x256xf32, #tpu.memory_space<any>> -> memref<1x256xf32, #tpu.memory_space<any>>
    %c4_i32_18 = arith.constant 4 : i32
    %c0_i32_19 = arith.constant 0 : i32
    %17 = tpu.memref_slice %arg1[%c4_i32_18, %c0_i32_19] : memref<8x256xf32, #tpu.memory_space<any>> -> memref<1x256xf32, #tpu.memory_space<any>>
    %18 = tpu.memref_slice %arg2[%c4_i32] : memref<8x!tpu.dma_semaphore, #tpu.memory_space<semaphore_mem>> -> memref<1x!tpu.dma_semaphore, #tpu.memory_space<semaphore_mem>>
    %19 = tpu.memref_squeeze %18 : memref<1x!tpu.dma_semaphore, #tpu.memory_space<semaphore_mem>> -> memref<!tpu.dma_semaphore, #tpu.memory_space<semaphore_mem>>
    tpu.enqueue_dma source(%16 : memref<1x256xf32, #tpu.memory_space<any>>) target(%17 : memref<1x256xf32, #tpu.memory_space<any>>) target_semaphore(%19 : memref<!tpu.dma_semaphore, #tpu.memory_space<semaphore_mem>>)
    %c5_i32 = arith.constant 5 : i32
    %c5_i32_20 = arith.constant 5 : i32
    %c0_i32_21 = arith.constant 0 : i32
    %20 = tpu.memref_slice %arg0[%c5_i32_20, %c0_i32_21] : memref<8x256xf32, #tpu.memory_space<any>> -> memref<1x256xf32, #tpu.memory_space<any>>
    %c5_i32_22 = arith.constant 5 : i32
    %c0_i32_23 = arith.constant 0 : i32
    %21 = tpu.memref_slice %arg1[%c5_i32_22, %c0_i32_23] : memref<8x256xf32, #tpu.memory_space<any>> -> memref<1x256xf32, #tpu.memory_space<any>>
    %22 = tpu.memref_slice %arg2[%c5_i32] : memref<8x!tpu.dma_semaphore, #tpu.memory_space<semaphore_mem>> -> memref<1x!tpu.dma_semaphore, #tpu.memory_space<semaphore_mem>>
    %23 = tpu.memref_squeeze %22 : memref<1x!tpu.dma_semaphore, #tpu.memory_space<semaphore_mem>> -> memref<!tpu.dma_semaphore, #tpu.memory_space<semaphore_mem>>
    tpu.enqueue_dma source(%20 : memref<1x256xf32, #tpu.memory_space<any>>) target(%21 : memref<1x256xf32, #tpu.memory_space<any>>) target_semaphore(%23 : memref<!tpu.dma_semaphore, #tpu.memory_space<semaphore_mem>>)
    %c6_i32 = arith.constant 6 : i32
    %c6_i32_24 = arith.constant 6 : i32
    %c0_i32_25 = arith.constant 0 : i32
    %24 = tpu.memref_slice %arg0[%c6_i32_24, %c0_i32_25] : memref<8x256xf32, #tpu.memory_space<any>> -> memref<1x256xf32, #tpu.memory_space<any>>
    %c6_i32_26 = arith.constant 6 : i32
    %c0_i32_27 = arith.constant 0 : i32
    %25 = tpu.memref_slice %arg1[%c6_i32_26, %c0_i32_27] : memref<8x256xf32, #tpu.memory_space<any>> -> memref<1x256xf32, #tpu.memory_space<any>>
    %26 = tpu.memref_slice %arg2[%c6_i32] : memref<8x!tpu.dma_semaphore, #tpu.memory_space<semaphore_mem>> -> memref<1x!tpu.dma_semaphore, #tpu.memory_space<semaphore_mem>>
    %27 = tpu.memref_squeeze %26 : memref<1x!tpu.dma_semaphore, #tpu.memory_space<semaphore_mem>> -> memref<!tpu.dma_semaphore, #tpu.memory_space<semaphore_mem>>
    tpu.enqueue_dma source(%24 : memref<1x256xf32, #tpu.memory_space<any>>) target(%25 : memref<1x256xf32, #tpu.memory_space<any>>) target_semaphore(%27 : memref<!tpu.dma_semaphore, #tpu.memory_space<semaphore_mem>>)
    %c7_i32 = arith.constant 7 : i32
    %c7_i32_28 = arith.constant 7 : i32
    %c0_i32_29 = arith.constant 0 : i32
    %28 = tpu.memref_slice %arg0[%c7_i32_28, %c0_i32_29] : memref<8x256xf32, #tpu.memory_space<any>> -> memref<1x256xf32, #tpu.memory_space<any>>
    %c7_i32_30 = arith.constant 7 : i32
    %c0_i32_31 = arith.constant 0 : i32
    %29 = tpu.memref_slice %arg1[%c7_i32_30, %c0_i32_31] : memref<8x256xf32, #tpu.memory_space<any>> -> memref<1x256xf32, #tpu.memory_space<any>>
    %30 = tpu.memref_slice %arg2[%c7_i32] : memref<8x!tpu.dma_semaphore, #tpu.memory_space<semaphore_mem>> -> memref<1x!tpu.dma_semaphore, #tpu.memory_space<semaphore_mem>>
    %31 = tpu.memref_squeeze %30 : memref<1x!tpu.dma_semaphore, #tpu.memory_space<semaphore_mem>> -> memref<!tpu.dma_semaphore, #tpu.memory_space<semaphore_mem>>
    tpu.enqueue_dma source(%28 : memref<1x256xf32, #tpu.memory_space<any>>) target(%29 : memref<1x256xf32, #tpu.memory_space<any>>) target_semaphore(%31 : memref<!tpu.dma_semaphore, #tpu.memory_space<semaphore_mem>>)
    %c0_i32_32 = arith.constant 0 : i32
    %c0_i32_33 = arith.constant 0 : i32
    %c0_i32_34 = arith.constant 0 : i32
    %32 = tpu.memref_slice %arg0[%c0_i32_33, %c0_i32_34] : memref<8x256xf32, #tpu.memory_space<any>> -> memref<1x256xf32, #tpu.memory_space<any>>
    %c0_i32_35 = arith.constant 0 : i32
    %c0_i32_36 = arith.constant 0 : i32
    %33 = tpu.memref_slice %arg1[%c0_i32_35, %c0_i32_36] : memref<8x256xf32, #tpu.memory_space<any>> -> memref<1x256xf32, #tpu.memory_space<any>>
    %34 = tpu.memref_slice %arg2[%c0_i32_32] : memref<8x!tpu.dma_semaphore, #tpu.memory_space<semaphore_mem>> -> memref<1x!tpu.dma_semaphore, #tpu.memory_space<semaphore_mem>>
    %35 = tpu.memref_squeeze %34 : memref<1x!tpu.dma_semaphore, #tpu.memory_space<semaphore_mem>> -> memref<!tpu.dma_semaphore, #tpu.memory_space<semaphore_mem>>
    tpu.wait_dma2 semaphore(%35 : memref<!tpu.dma_semaphore, #tpu.memory_space<semaphore_mem>>) src(%32 : memref<1x256xf32, #tpu.memory_space<any>>) dst(%33 : memref<1x256xf32, #tpu.memory_space<any>>)
    %c1_i32_37 = arith.constant 1 : i32
    %c1_i32_38 = arith.constant 1 : i32
    %c0_i32_39 = arith.constant 0 : i32
    %36 = tpu.memref_slice %arg0[%c1_i32_38, %c0_i32_39] : memref<8x256xf32, #tpu.memory_space<any>> -> memref<1x256xf32, #tpu.memory_space<any>>
    %c1_i32_40 = arith.constant 1 : i32
    %c0_i32_41 = arith.constant 0 : i32
    %37 = tpu.memref_slice %arg1[%c1_i32_40, %c0_i32_41] : memref<8x256xf32, #tpu.memory_space<any>> -> memref<1x256xf32, #tpu.memory_space<any>>
    %38 = tpu.memref_slice %arg2[%c1_i32_37] : memref<8x!tpu.dma_semaphore, #tpu.memory_space<semaphore_mem>> -> memref<1x!tpu.dma_semaphore, #tpu.memory_space<semaphore_mem>>
    %39 = tpu.memref_squeeze %38 : memref<1x!tpu.dma_semaphore, #tpu.memory_space<semaphore_mem>> -> memref<!tpu.dma_semaphore, #tpu.memory_space<semaphore_mem>>
    tpu.wait_dma2 semaphore(%39 : memref<!tpu.dma_semaphore, #tpu.memory_space<semaphore_mem>>) src(%36 : memref<1x256xf32, #tpu.memory_space<any>>) dst(%37 : memref<1x256xf32, #tpu.memory_space<any>>)
    %c2_i32_42 = arith.constant 2 : i32
    %c2_i32_43 = arith.constant 2 : i32
    %c0_i32_44 = arith.constant 0 : i32
    %40 = tpu.memref_slice %arg0[%c2_i32_43, %c0_i32_44] : memref<8x256xf32, #tpu.memory_space<any>> -> memref<1x256xf32, #tpu.memory_space<any>>
    %c2_i32_45 = arith.constant 2 : i32
    %c0_i32_46 = arith.constant 0 : i32
    %41 = tpu.memref_slice %arg1[%c2_i32_45, %c0_i32_46] : memref<8x256xf32, #tpu.memory_space<any>> -> memref<1x256xf32, #tpu.memory_space<any>>
    %42 = tpu.memref_slice %arg2[%c2_i32_42] : memref<8x!tpu.dma_semaphore, #tpu.memory_space<semaphore_mem>> -> memref<1x!tpu.dma_semaphore, #tpu.memory_space<semaphore_mem>>
    %43 = tpu.memref_squeeze %42 : memref<1x!tpu.dma_semaphore, #tpu.memory_space<semaphore_mem>> -> memref<!tpu.dma_semaphore, #tpu.memory_space<semaphore_mem>>
    tpu.wait_dma2 semaphore(%43 : memref<!tpu.dma_semaphore, #tpu.memory_space<semaphore_mem>>) src(%40 : memref<1x256xf32, #tpu.memory_space<any>>) dst(%41 : memref<1x256xf32, #tpu.memory_space<any>>)
    %c3_i32_47 = arith.constant 3 : i32
    %c3_i32_48 = arith.constant 3 : i32
    %c0_i32_49 = arith.constant 0 : i32
    %44 = tpu.memref_slice %arg0[%c3_i32_48, %c0_i32_49] : memref<8x256xf32, #tpu.memory_space<any>> -> memref<1x256xf32, #tpu.memory_space<any>>
    %c3_i32_50 = arith.constant 3 : i32
    %c0_i32_51 = arith.constant 0 : i32
    %45 = tpu.memref_slice %arg1[%c3_i32_50, %c0_i32_51] : memref<8x256xf32, #tpu.memory_space<any>> -> memref<1x256xf32, #tpu.memory_space<any>>
    %46 = tpu.memref_slice %arg2[%c3_i32_47] : memref<8x!tpu.dma_semaphore, #tpu.memory_space<semaphore_mem>> -> memref<1x!tpu.dma_semaphore, #tpu.memory_space<semaphore_mem>>
    %47 = tpu.memref_squeeze %46 : memref<1x!tpu.dma_semaphore, #tpu.memory_space<semaphore_mem>> -> memref<!tpu.dma_semaphore, #tpu.memory_space<semaphore_mem>>
    tpu.wait_dma2 semaphore(%47 : memref<!tpu.dma_semaphore, #tpu.memory_space<semaphore_mem>>) src(%44 : memref<1x256xf32, #tpu.memory_space<any>>) dst(%45 : memref<1x256xf32, #tpu.memory_space<any>>)
    %c4_i32_52 = arith.constant 4 : i32
    %c4_i32_53 = arith.constant 4 : i32
    %c0_i32_54 = arith.constant 0 : i32
    %48 = tpu.memref_slice %arg0[%c4_i32_53, %c0_i32_54] : memref<8x256xf32, #tpu.memory_space<any>> -> memref<1x256xf32, #tpu.memory_space<any>>
    %c4_i32_55 = arith.constant 4 : i32
    %c0_i32_56 = arith.constant 0 : i32
    %49 = tpu.memref_slice %arg1[%c4_i32_55, %c0_i32_56] : memref<8x256xf32, #tpu.memory_space<any>> -> memref<1x256xf32, #tpu.memory_space<any>>
    %50 = tpu.memref_slice %arg2[%c4_i32_52] : memref<8x!tpu.dma_semaphore, #tpu.memory_space<semaphore_mem>> -> memref<1x!tpu.dma_semaphore, #tpu.memory_space<semaphore_mem>>
    %51 = tpu.memref_squeeze %50 : memref<1x!tpu.dma_semaphore, #tpu.memory_space<semaphore_mem>> -> memref<!tpu.dma_semaphore, #tpu.memory_space<semaphore_mem>>
    tpu.wait_dma2 semaphore(%51 : memref<!tpu.dma_semaphore, #tpu.memory_space<semaphore_mem>>) src(%48 : memref<1x256xf32, #tpu.memory_space<any>>) dst(%49 : memref<1x256xf32, #tpu.memory_space<any>>)
    %c5_i32_57 = arith.constant 5 : i32
    %c5_i32_58 = arith.constant 5 : i32
    %c0_i32_59 = arith.constant 0 : i32
    %52 = tpu.memref_slice %arg0[%c5_i32_58, %c0_i32_59] : memref<8x256xf32, #tpu.memory_space<any>> -> memref<1x256xf32, #tpu.memory_space<any>>
    %c5_i32_60 = arith.constant 5 : i32
    %c0_i32_61 = arith.constant 0 : i32
    %53 = tpu.memref_slice %arg1[%c5_i32_60, %c0_i32_61] : memref<8x256xf32, #tpu.memory_space<any>> -> memref<1x256xf32, #tpu.memory_space<any>>
    %54 = tpu.memref_slice %arg2[%c5_i32_57] : memref<8x!tpu.dma_semaphore, #tpu.memory_space<semaphore_mem>> -> memref<1x!tpu.dma_semaphore, #tpu.memory_space<semaphore_mem>>
    %55 = tpu.memref_squeeze %54 : memref<1x!tpu.dma_semaphore, #tpu.memory_space<semaphore_mem>> -> memref<!tpu.dma_semaphore, #tpu.memory_space<semaphore_mem>>
    tpu.wait_dma2 semaphore(%55 : memref<!tpu.dma_semaphore, #tpu.memory_space<semaphore_mem>>) src(%52 : memref<1x256xf32, #tpu.memory_space<any>>) dst(%53 : memref<1x256xf32, #tpu.memory_space<any>>)
    %c6_i32_62 = arith.constant 6 : i32
    %c6_i32_63 = arith.constant 6 : i32
    %c0_i32_64 = arith.constant 0 : i32
    %56 = tpu.memref_slice %arg0[%c6_i32_63, %c0_i32_64] : memref<8x256xf32, #tpu.memory_space<any>> -> memref<1x256xf32, #tpu.memory_space<any>>
    %c6_i32_65 = arith.constant 6 : i32
    %c0_i32_66 = arith.constant 0 : i32
    %57 = tpu.memref_slice %arg1[%c6_i32_65, %c0_i32_66] : memref<8x256xf32, #tpu.memory_space<any>> -> memref<1x256xf32, #tpu.memory_space<any>>
    %58 = tpu.memref_slice %arg2[%c6_i32_62] : memref<8x!tpu.dma_semaphore, #tpu.memory_space<semaphore_mem>> -> memref<1x!tpu.dma_semaphore, #tpu.memory_space<semaphore_mem>>
    %59 = tpu.memref_squeeze %58 : memref<1x!tpu.dma_semaphore, #tpu.memory_space<semaphore_mem>> -> memref<!tpu.dma_semaphore, #tpu.memory_space<semaphore_mem>>
    tpu.wait_dma2 semaphore(%59 : memref<!tpu.dma_semaphore, #tpu.memory_space<semaphore_mem>>) src(%56 : memref<1x256xf32, #tpu.memory_space<any>>) dst(%57 : memref<1x256xf32, #tpu.memory_space<any>>)
    %c7_i32_67 = arith.constant 7 : i32
    %c7_i32_68 = arith.constant 7 : i32
    %c0_i32_69 = arith.constant 0 : i32
    %60 = tpu.memref_slice %arg0[%c7_i32_68, %c0_i32_69] : memref<8x256xf32, #tpu.memory_space<any>> -> memref<1x256xf32, #tpu.memory_space<any>>
    %c7_i32_70 = arith.constant 7 : i32
    %c0_i32_71 = arith.constant 0 : i32
    %61 = tpu.memref_slice %arg1[%c7_i32_70, %c0_i32_71] : memref<8x256xf32, #tpu.memory_space<any>> -> memref<1x256xf32, #tpu.memory_space<any>>
    %62 = tpu.memref_slice %arg2[%c7_i32_67] : memref<8x!tpu.dma_semaphore, #tpu.memory_space<semaphore_mem>> -> memref<1x!tpu.dma_semaphore, #tpu.memory_space<semaphore_mem>>
    %63 = tpu.memref_squeeze %62 : memref<1x!tpu.dma_semaphore, #tpu.memory_space<semaphore_mem>> -> memref<!tpu.dma_semaphore, #tpu.memory_space<semaphore_mem>>
    tpu.wait_dma2 semaphore(%63 : memref<!tpu.dma_semaphore, #tpu.memory_space<semaphore_mem>>) src(%60 : memref<1x256xf32, #tpu.memory_space<any>>) dst(%61 : memref<1x256xf32, #tpu.memory_space<any>>)
    return
  }
}

</mosaic_0001>

<bundles_post_ra>
// kernel: tpu_custom_call.1
= control target key start
LH: loop header
LB: loop body
LE: loop exit
PB: predicated region body
PF: predicated region fallthrough
CT: control target
= control target key end

     0   :  { %s294_s6 = smov 128   ;;  %s295_s7 = smov 1   ;;  %s403_s0 = inlined_call_operand.hbm [shape: f32[8,256], index: 0, kind: input, shape index: {}]   ;;  %s404_s1 = inlined_call_operand.hbm [shape: f32[8,256], index: 1, kind: output, shape index: {}]  }
   0x1   :  { %18 = sst [smem:[#allocation4]] %s294_s6  ;;  %s296_s8 = smov [#allocation2]  }
   0x2   :  { %20 = sst [smem:[#allocation4 + $0x1]] %s294_s6  ;;  %s297_s9 = smov [#allocation3]  }
   0x3   :  { %22 = sst [smem:[#allocation4 + $0x2]] %s295_s7  ;;  %s298_s10 = smov 0  }
   0x4   :  { %24 = dma.general %s403_s0, 32, %s404_s1, %s296_s8, %s297_s9, [#allocation4], %s298_s10, 0  }
   0x5   :  { %40 = sst [smem:[#allocation6]] %s294_s6  ;;  %s25_s17 = scalar_lea.hbm %s403_s0, 16 }
   0x6   :  { %42 = sst [smem:[#allocation6 + $0x1]] %s294_s6  ;;  %s26_s20 = scalar_lea.hbm %s404_s1, 16 }
   0x7   :  { %44 = sst [smem:[#allocation6 + $0x2]] %s295_s7  ;;  %s47_s23 = scalar_lea.hbm %s403_s0, 32 }
   0x8   :  { %s299_s24 = smov [#allocation2 + $0x1]   ;;  %s300_s25 = smov [#allocation5]  }
   0x9   :  { %46 = dma.general %s25_s17, 32, %s26_s20, %s299_s24, %s300_s25, [#allocation6], %s298_s10, 0  }
   0xa   :  { %62 = sst [smem:[#allocation8]] %s294_s6  ;;  %s48_s28 = scalar_lea.hbm %s404_s1, 32 }
   0xb   :  { %64 = sst [smem:[#allocation8 + $0x1]] %s294_s6  ;;  %s301_s29 = smov [#allocation2 + $0x2]  }
   0xc   :  { %66 = sst [smem:[#allocation8 + $0x2]] %s295_s7  ;;  %s302_s30 = smov [#allocation7]  }
   0xd   :  { %68 = dma.general %s47_s23, 32, %s48_s28, %s301_s29, %s302_s30, [#allocation8], %s298_s10, 0  }
   0xe   :  { %84 = sst [smem:[#allocation10]] %s294_s6  ;;  %s69_s4 = scalar_lea.hbm %s403_s0, 48 }
   0xf   :  { %86 = sst [smem:[#allocation10 + $0x1]] %s294_s6  ;;  %s70_s9 = scalar_lea.hbm %s404_s1, 48 }
  0x10   :  { %88 = sst [smem:[#allocation10 + $0x2]] %s295_s7  ;;  %s91_s13 = scalar_lea.hbm %s403_s0, 64 }
  0x11   :  { %s303_s14 = smov [#allocation2 + $0x3]   ;;  %s304_s15 = smov [#allocation9]  }
  0x12   :  { %90 = dma.general %s69_s4, 32, %s70_s9, %s303_s14, %s304_s15, [#allocation10], %s298_s10, 0  }
  0x13   :  { %106 = sst [smem:[#allocation12]] %s294_s6  ;;  %s92_s18 = scalar_lea.hbm %s404_s1, 64 }
  0x14   :  { %108 = sst [smem:[#allocation12 + $0x1]] %s294_s6  ;;  %s305_s19 = smov [#allocation2 + $0x4]  }
  0x15   :  { %110 = sst [smem:[#allocation12 + $0x2]] %s295_s7  ;;  %s306_s20 = smov [#allocation11]  }
  0x16   :  { %112 = dma.general %s91_s13, 32, %s92_s18, %s305_s19, %s306_s20, [#allocation12], %s298_s10, 0  }
  0x17   :  { %128 = sst [smem:[#allocation14]] %s294_s6  ;;  %s113_s23 = scalar_lea.hbm %s403_s0, 80 }
  0x18   :  { %130 = sst [smem:[#allocation14 + $0x1]] %s294_s6  ;;  %s114_s26 = scalar_lea.hbm %s404_s1, 80 }
  0x19   :  { %132 = sst [smem:[#allocation14 + $0x2]] %s295_s7  ;;  %s135_s29 = scalar_lea.hbm %s403_s0, 96 }
  0x1a   :  { %s307_s30 = smov [#allocation2 + $0x5]   ;;  %s308_s2 = smov [#allocation13]  }
  0x1b   :  { %134 = dma.general %s113_s23, 32, %s114_s26, %s307_s30, %s308_s2, [#allocation14], %s298_s10, 0  }
  0x1c   :  { %150 = sst [smem:[#allocation16]] %s294_s6  ;;  %s136_s5 = scalar_lea.hbm %s404_s1, 96 }
  0x1d   :  { %152 = sst [smem:[#allocation16 + $0x1]] %s294_s6  ;;  %s309_s8 = smov [#allocation2 + $0x6]  }
  0x1e   :  { %154 = sst [smem:[#allocation16 + $0x2]] %s295_s7  ;;  %s310_s9 = smov [#allocation15]  }
  0x1f   :  { %156 = dma.general %s135_s29, 32, %s136_s5, %s309_s8, %s310_s9, [#allocation16], %s298_s10, 0  }
  0x20   :  { %172 = sst [smem:[#allocation18]] %s294_s6  ;;  %s157_s13 = scalar_lea.hbm %s403_s0, 112 }
  0x21   :  { %174 = sst [smem:[#allocation18 + $0x1]] %s294_s6  ;;  %s158_s16 = scalar_lea.hbm %s404_s1, 112 }
  0x22   :  { %176 = sst [smem:[#allocation18 + $0x2]] %s295_s7  ;;  %s311_s17 = smov [#allocation2 + $0x7]  }
  0x23   :  { %s312_s18 = smov [#allocation17]  }
  0x24   :  { %178 = dma.general %s157_s13, 32, %s158_s16, %s311_s17, %s312_s18, [#allocation18], %s298_s10, 0  }
  0x25   :  { %278 = dma.done.wait [#allocation2], 32 }
  0x26   :  { %279 = vsyncadd [#allocation2], 4294967264 }
  0x27   :  { %280 = dma.done.wait [#allocation2 + $0x1], 32 }
  0x28   :  { %281 = vsyncadd [#allocation2 + $0x1], 4294967264 }
  0x29   :  { %282 = dma.done.wait [#allocation2 + $0x2], 32 }
  0x2a   :  { %283 = vsyncadd [#allocation2 + $0x2], 4294967264 }
  0x2b   :  { %284 = dma.done.wait [#allocation2 + $0x3], 32 }
  0x2c   :  { %285 = vsyncadd [#allocation2 + $0x3], 4294967264 }
  0x2d   :  { %286 = dma.done.wait [#allocation2 + $0x4], 32 }
  0x2e   :  { %287 = vsyncadd [#allocation2 + $0x4], 4294967264 }
  0x2f   :  { %288 = dma.done.wait [#allocation2 + $0x5], 32 }
  0x30   :  { %289 = vsyncadd [#allocation2 + $0x5], 4294967264 }
  0x31   :  { %290 = dma.done.wait [#allocation2 + $0x6], 32 }
  0x32   :  { %291 = vsyncadd [#allocation2 + $0x6], 4294967264 }
  0x33   :  { %292 = dma.done.wait [#allocation2 + $0x7], 32 }
  0x34   :  { %293 = vsyncadd [#allocation2 + $0x7], 4294967264 }
  0x35   :  { %196 = vsyncmov [#allocation2] }
  0x38   :  { %s197_s0 = vpop.sfrf %196 }
  0x39   :  { %p251_p0 = scmp.ne.s32.totalorder %s197_s0, 0 }
  0x3b   :  { %201 = shalt.err (%p251_p0)  }
  0x3c   :  { %203 = vsyncmov [#allocation2 + $0x1] }
  0x3f   :  { %s204_s1 = vpop.sfrf %203 }
  0x40   :  { %p252_p1 = scmp.ne.s32.totalorder %s204_s1, 0 }
  0x42   :  { %208 = shalt.err (%p252_p1)  }
  0x43   :  { %210 = vsyncmov [#allocation2 + $0x2] }
  0x46   :  { %s211_s6 = vpop.sfrf %210 }
  0x47   :  { %p253_p2 = scmp.ne.s32.totalorder %s211_s6, 0 }
  0x49   :  { %215 = shalt.err (%p253_p2)  }
  0x4a   :  { %217 = vsyncmov [#allocation2 + $0x3] }
  0x4d   :  { %s218_s7 = vpop.sfrf %217 }
  0x4e   :  { %p254_p3 = scmp.ne.s32.totalorder %s218_s7, 0 }
  0x50   :  { %222 = shalt.err (%p254_p3)  }
  0x51   :  { %224 = vsyncmov [#allocation2 + $0x4] }
  0x54   :  { %s225_s10 = vpop.sfrf %224 }
  0x55   :  { %p255_p4 = scmp.ne.s32.totalorder %s225_s10, 0 }
  0x57   :  { %229 = shalt.err (%p255_p4)  }
  0x58   :  { %231 = vsyncmov [#allocation2 + $0x5] }
  0x5b   :  { %s232_s19 = vpop.sfrf %231 }
  0x5c   :  { %p256_p5 = scmp.ne.s32.totalorder %s232_s19, 0 }
  0x5e   :  { %236 = shalt.err (%p256_p5)  }
  0x5f   :  { %238 = vsyncmov [#allocation2 + $0x6] }
  0x62   :  { %s239_s20 = vpop.sfrf %238 }
  0x63   :  { %p257_p6 = scmp.ne.s32.totalorder %s239_s20, 0 }
  0x65   :  { %243 = shalt.err (%p257_p6)  }
  0x66   :  { %245 = vsyncmov [#allocation2 + $0x7] }
  0x69   :  { %s246_s21 = vpop.sfrf %245 }
  0x6a   :  { %p258_p7 = scmp.ne.s32.totalorder %s246_s21, 0 }
  0x6c   :  { %250 = shalt.err (%p258_p7)  }

</bundles_post_ra>
